<compile_context>
chip_gen: v6e
topology: v6e:2x2x1
jax: 0.10.0
libtpu: 0.0.40
codegen_flags: <defaults>
</compile_context>

<pallas_src>
import functools

import jax
import jax.numpy as jnp
from jax import lax
from jax.experimental import pallas as pl
from jax.experimental.pallas import tpu as pltpu


def _pick_tile_h(H, W):
    """Pick an H tile so the flattened output block (tH*W lanes) is a multiple
    of 128 and large enough to amortize per-step overhead; fall back to the
    whole image if no divisor of H works."""
    target = max(128, min(1024, (H * W) // 2))
    for t in range(1, H):
        if H % t == 0 and (t * W) % 128 == 0 and t * W >= target:
            return t
    return H


def _conv_cat_kernel(x_ref, w_ref, b_ref, o_ref, p_ref, *, W, tH, G0, G0p):
    """Fused 3x3 conv + bias + ReLU + channel-concat for one (batch, H-tile).

    x_ref : (1, 1, G0p, (tH+2)*(W+2))  zero-padded input rows of this tile,
                                        pixels flattened y*(W+2)+x on lanes
    w_ref : (G0+G, 9*G0p)               [identity passthrough rows ; conv rows]
    b_ref : (G0+G, 1)                   [zeros ; conv bias]
    o_ref : (1, G0+G, tH*W)             concat(x, relu(conv(x)+b)) for the tile
    p_ref : (9*G0p, Npix) VMEM scratch  transposed im2col patch slab (x dtype)
    """
    Wp = W + 2
    Npix = tH * Wp - 2                     # conv positions on the padded-x grid

    xtile = x_ref[0, 0]                    # (G0p, (tH+2)*Wp), lane-dense load

    # Transposed im2col: tap (kh, kw) is a static lane-shifted copy of the
    # tile, all channels at once (channels already sit on sublanes).  Scratch
    # stores are 8-sublane aligned because G0p is a multiple of 8.
    for t in range(9):
        kh, kw = divmod(t, 3)
        d = kh * Wp + kw
        p_ref[t * G0p:(t + 1) * G0p, :] = xtile[:, d:d + Npix]

    # Single MXU matmul produces BOTH the passthrough copy of x (one-hot rows
    # of w_ref) and the conv pre-activations -> in-kernel channel concat.
    pre = jnp.dot(w_ref[...], p_ref[...],
                  preferred_element_type=jnp.float32)           # (G0+G, Npix)
    pre = pre + b_ref[...]                                      # bias, 1 pass

    # ReLU only on the conv rows; passthrough rows keep their sign.
    row = lax.broadcasted_iota(jnp.int32, pre.shape, 0)
    act = jnp.where(row >= G0, jnp.maximum(pre, 0.0), pre)

    # Drop the 2 padded columns of every image row -> dense tH*W output lanes.
    out = jnp.concatenate(
        [act[:, y * Wp:y * Wp + W] for y in range(tH)], axis=-1)  # (G0+G, tH*W)
    o_ref[0] = out.astype(o_ref.dtype)


def one_conv_forward(x_nchw, weight_oihw, bias):
    """Replicates one_conv.forward: cat((x, relu(conv3x3(x)+b)), dim=1), NCHW."""
    B, G0, H, W = x_nchw.shape
    G = weight_oihw.shape[0]
    C_out = G0 + G
    G0p = -(-G0 // 8) * 8                  # pad channels to a sublane tile
    Wp = W + 2
    dtype = x_nchw.dtype

    tH = _pick_tile_h(H, W)
    nH = H // tH
    Ltile = (tH + 2) * Wp
    Npix = tH * Wp - 2

    # ---- input prep: one fused channel+spatial zero-pad, then per-H-tile
    # halo slices, flattened to the lane-dense NCHW-flat layout. -------------
    x_pad = jnp.pad(x_nchw, ((0, 0), (0, G0p - G0), (1, 1), (1, 1)))
    x_flat = x_pad.reshape(B, G0p, (H + 2) * Wp)
    x_tiles = jnp.stack(
        [lax.slice_in_dim(x_flat, h * tH * Wp, h * tH * Wp + Ltile, axis=2)
         for h in range(nH)],
        axis=1)                                            # (B, nH, G0p, Ltile)

    # ---- weight slab: [identity center-tap rows ; conv rows], K = 9*G0p ----
    w_pad = jnp.pad(weight_oihw.astype(dtype),
                    ((0, 0), (0, G0p - G0), (0, 0), (0, 0)))       # (G,G0p,3,3)
    w_conv = jnp.transpose(w_pad, (0, 2, 3, 1)).reshape(G, 9 * G0p)
    eye = jnp.zeros((G0, 9 * G0p), dtype)
    eye = eye.at[jnp.arange(G0), 4 * G0p + jnp.arange(G0)].set(1.0)  # (kh,kw)=(1,1)
    w_big = jnp.concatenate([eye, w_conv], axis=0)                   # (C_out, 9*G0p)
    b_big = jnp.concatenate(
        [jnp.zeros((G0,), jnp.float32),
         bias.astype(jnp.float32)]).reshape(C_out, 1)

    kernel = functools.partial(_conv_cat_kernel, W=W, tH=tH, G0=G0, G0p=G0p)

    out_flat = pl.pallas_call(
        kernel,
        out_shape=jax.ShapeDtypeStruct((B, C_out, H * W), dtype),
        grid_spec=pltpu.PrefetchScalarGridSpec(
            num_scalar_prefetch=0,
            grid=(B, nH),
            in_specs=[
                pl.BlockSpec((1, 1, G0p, Ltile), lambda b, h: (b, h, 0, 0)),
                pl.BlockSpec((C_out, 9 * G0p), lambda b, h: (0, 0)),
                pl.BlockSpec((C_out, 1), lambda b, h: (0, 0)),
            ],
            out_specs=pl.BlockSpec((1, C_out, tH * W), lambda b, h: (b, 0, h)),
            scratch_shapes=[pltpu.VMEM((9 * G0p, Npix), dtype)],
        ),
        compiler_params=pltpu.CompilerParams(
            dimension_semantics=("parallel", "parallel"),
            vmem_limit_bytes=32 * 1024 * 1024,   # safe on v5e/v6e/v7x; blocks are tiny
        ),
    )(x_tiles, w_big, b_big)

    # Already NCHW-flat; this reshape is free (contiguous).
    return out_flat.reshape(B, C_out, H, W)


def reference_forward(x_nchw, weight_oihw, bias):
    conv = lax.conv_general_dilated(
        x_nchw, weight_oihw, window_strides=(1, 1), padding=((1, 1), (1, 1)),
        dimension_numbers=("NCHW", "OIHW", "NCHW"))
    conv = jnp.maximum(conv + bias.reshape(1, -1, 1, 1), 0.0)
    return jnp.concatenate([x_nchw, conv], axis=1)


if __name__ == "__main__":
    B, G0, G, H, W = 2, 4, 8, 16, 16

    key = jax.random.PRNGKey(0)
    kx, kw, kb = jax.random.split(key, 3)
    x = jax.random.normal(kx, (B, G0, H, W), jnp.float32)
    weight = jax.random.normal(kw, (G, G0, 3, 3), jnp.float32) * 0.1   # OIHW
    bias = jax.random.normal(kb, (G,), jnp.float32) * 0.1

    out = jax.block_until_ready(one_conv_forward(x, weight, bias))
    ref = reference_forward(x, weight, bias)

    assert out.shape == (B, G0 + G, H, W)
    assert jnp.allclose(out, ref, atol=1e-4, rtol=1e-4), \
        float(jnp.max(jnp.abs(out - ref)))

    print("KERNEL_OK")
</pallas_src>

<mosaic_0001>
module attributes {stable_mosaic.version = 11 : i64} {
  func.func @_conv_cat_kernel(%arg0: i32, %arg1: i32, %arg2: memref<1x1x8x180xf32, #tpu.memory_space<vmem>>, %arg3: memref<12x72xf32, #tpu.memory_space<vmem>>, %arg4: memref<12x1xf32, #tpu.memory_space<vmem>>, %arg5: memref<1x12x128xf32, #tpu.memory_space<vmem>>, %arg6: memref<72x142xf32, #tpu.memory_space<vmem>>) attributes {dimension_semantics = [#tpu.dimension_semantics<parallel>, #tpu.dimension_semantics<parallel>], iteration_bounds = array<i64: 2, 2>, scalar_prefetch = 0 : i64, scratch_operands = 1 : i64, tpu.core_type = #tpu.core_type<tc>, window_params = [{transform_indices = @transform_0, window_bounds = array<i64: 1, 1, 8, 180>}, {pipeline_mode = #tpu.pipeline_mode<synchronous>, transform_indices = @transform_1, window_bounds = array<i64: 12, 72>}, {pipeline_mode = #tpu.pipeline_mode<synchronous>, transform_indices = @transform_2, window_bounds = array<i64: 12, 1>}, {transform_indices = @transform_3, window_bounds = array<i64: 1, 12, 128>}]} {
    %c0 = arith.constant 0 : index
    %c0_0 = arith.constant 0 : index
    %c0_1 = arith.constant 0 : index
    %c0_2 = arith.constant 0 : index
    %0 = vector.load %arg2[%c0, %c0_0, %c0_1, %c0_2] : memref<1x1x8x180xf32, #tpu.memory_space<vmem>>, vector<1x1x8x180xf32>
    %1 = vector.shape_cast %0 : vector<1x1x8x180xf32> to vector<8x180xf32>
    %2 = vector.extract_strided_slice %1 {offsets = [0, 0], sizes = [8, 142], strides = [1, 1]} : vector<8x180xf32> to vector<8x142xf32>
    %c0_3 = arith.constant 0 : index
    %c0_4 = arith.constant 0 : index
    %3 = vector.load %arg6[%c0_3, %c0_4] : memref<72x142xf32, #tpu.memory_space<vmem>>, vector<8x142xf32>
    tpu.vector_store %arg6[%c0_3, %c0_4], %2 {strides = array<i32>} : memref<72x142xf32, #tpu.memory_space<vmem>>, vector<8x142xf32>,
    %4 = vector.extract_strided_slice %1 {offsets = [0, 1], sizes = [8, 142], strides = [1, 1]} : vector<8x180xf32> to vector<8x142xf32>
    %c8 = arith.constant 8 : index
    %c0_5 = arith.constant 0 : index
    %5 = vector.load %arg6[%c8, %c0_5] : memref<72x142xf32, #tpu.memory_space<vmem>>, vector<8x142xf32>
    tpu.vector_store %arg6[%c8, %c0_5], %4 {strides = array<i32>} : memref<72x142xf32, #tpu.memory_space<vmem>>, vector<8x142xf32>,
    %6 = vector.extract_strided_slice %1 {offsets = [0, 2], sizes = [8, 142], strides = [1, 1]} : vector<8x180xf32> to vector<8x142xf32>
    %c16 = arith.constant 16 : index
    %c0_6 = arith.constant 0 : index
    %7 = vector.load %arg6[%c16, %c0_6] : memref<72x142xf32, #tpu.memory_space<vmem>>, vector<8x142xf32>
    tpu.vector_store %arg6[%c16, %c0_6], %6 {strides = array<i32>} : memref<72x142xf32, #tpu.memory_space<vmem>>, vector<8x142xf32>,
    %8 = vector.extract_strided_slice %1 {offsets = [0, 18], sizes = [8, 142], strides = [1, 1]} : vector<8x180xf32> to vector<8x142xf32>
    %c24 = arith.constant 24 : index
    %c0_7 = arith.constant 0 : index
    %9 = vector.load %arg6[%c24, %c0_7] : memref<72x142xf32, #tpu.memory_space<vmem>>, vector<8x142xf32>
    tpu.vector_store %arg6[%c24, %c0_7], %8 {strides = array<i32>} : memref<72x142xf32, #tpu.memory_space<vmem>>, vector<8x142xf32>,
    %10 = vector.extract_strided_slice %1 {offsets = [0, 19], sizes = [8, 142], strides = [1, 1]} : vector<8x180xf32> to vector<8x142xf32>
    %c32 = arith.constant 32 : index
    %c0_8 = arith.constant 0 : index
    %11 = vector.load %arg6[%c32, %c0_8] : memref<72x142xf32, #tpu.memory_space<vmem>>, vector<8x142xf32>
    tpu.vector_store %arg6[%c32, %c0_8], %10 {strides = array<i32>} : memref<72x142xf32, #tpu.memory_space<vmem>>, vector<8x142xf32>,
    %12 = vector.extract_strided_slice %1 {offsets = [0, 20], sizes = [8, 142], strides = [1, 1]} : vector<8x180xf32> to vector<8x142xf32>
    %c40 = arith.constant 40 : index
    %c0_9 = arith.constant 0 : index
    %13 = vector.load %arg6[%c40, %c0_9] : memref<72x142xf32, #tpu.memory_space<vmem>>, vector<8x142xf32>
    tpu.vector_store %arg6[%c40, %c0_9], %12 {strides = array<i32>} : memref<72x142xf32, #tpu.memory_space<vmem>>, vector<8x142xf32>,
    %14 = vector.extract_strided_slice %1 {offsets = [0, 36], sizes = [8, 142], strides = [1, 1]} : vector<8x180xf32> to vector<8x142xf32>
    %c48 = arith.constant 48 : index
    %c0_10 = arith.constant 0 : index
    %15 = vector.load %arg6[%c48, %c0_10] : memref<72x142xf32, #tpu.memory_space<vmem>>, vector<8x142xf32>
    tpu.vector_store %arg6[%c48, %c0_10], %14 {strides = array<i32>} : memref<72x142xf32, #tpu.memory_space<vmem>>, vector<8x142xf32>,
    %16 = vector.extract_strided_slice %1 {offsets = [0, 37], sizes = [8, 142], strides = [1, 1]} : vector<8x180xf32> to vector<8x142xf32>
    %c56 = arith.constant 56 : index
    %c0_11 = arith.constant 0 : index
    %17 = vector.load %arg6[%c56, %c0_11] : memref<72x142xf32, #tpu.memory_space<vmem>>, vector<8x142xf32>
    tpu.vector_store %arg6[%c56, %c0_11], %16 {strides = array<i32>} : memref<72x142xf32, #tpu.memory_space<vmem>>, vector<8x142xf32>,
    %18 = vector.extract_strided_slice %1 {offsets = [0, 38], sizes = [8, 142], strides = [1, 1]} : vector<8x180xf32> to vector<8x142xf32>
    %c64 = arith.constant 64 : index
    %c0_12 = arith.constant 0 : index
    %19 = vector.load %arg6[%c64, %c0_12] : memref<72x142xf32, #tpu.memory_space<vmem>>, vector<8x142xf32>
    tpu.vector_store %arg6[%c64, %c0_12], %18 {strides = array<i32>} : memref<72x142xf32, #tpu.memory_space<vmem>>, vector<8x142xf32>,
    %c0_13 = arith.constant 0 : index
    %c0_14 = arith.constant 0 : index
    %20 = vector.load %arg3[%c0_13, %c0_14] : memref<12x72xf32, #tpu.memory_space<vmem>>, vector<12x72xf32>
    %c0_15 = arith.constant 0 : index
    %c0_16 = arith.constant 0 : index
    %21 = vector.load %arg6[%c0_15, %c0_16] : memref<72x142xf32, #tpu.memory_space<vmem>>, vector<72x142xf32>
    %cst = arith.constant dense<0.000000e+00> : vector<12x142xf32>
    %22 = tpu.matmul %20, %21, %cst {dimension_numbers = #tpu.dot_dimension_numbers<[1], [0], [0], [1], [0, 0, 1, 1], [], []>} : vector<12x72xf32>, vector<72x142xf32>, vector<12x142xf32> -> vector<12x142xf32>
    %c0_17 = arith.constant 0 : index
    %c0_18 = arith.constant 0 : index
    %23 = vector.load %arg4[%c0_17, %c0_18] : memref<12x1xf32, #tpu.memory_space<vmem>>, vector<12x1xf32>
    %24 = vector.broadcast %23 : vector<12x1xf32> to vector<12x142xf32>
    %25 = arith.addf %22, %24 : vector<12x142xf32>
    %26 = tpu.iota {dimensions = array<i32: 0>} : vector<12x142xi32>
    %c4_i32 = arith.constant 4 : i32
    %27 = vector.broadcast %c4_i32 : i32 to vector<12x142xi32>
    %28 = arith.cmpi sge, %26, %27 : vector<12x142xi32>
    %cst_19 = arith.constant 0.000000e+00 : f32
    %29 = vector.broadcast %cst_19 : f32 to vector<12x142xf32>
    %30 = arith.maximumf %25, %29 : vector<12x142xf32>
    %31 = arith.select %28, %30, %25 : vector<12x142xi1>, vector<12x142xf32>
    %32 = vector.extract_strided_slice %31 {offsets = [0, 0], sizes = [12, 16], strides = [1, 1]} : vector<12x142xf32> to vector<12x16xf32>
    %33 = vector.extract_strided_slice %31 {offsets = [0, 18], sizes = [12, 16], strides = [1, 1]} : vector<12x142xf32> to vector<12x16xf32>
    %34 = vector.extract_strided_slice %31 {offsets = [0, 36], sizes = [12, 16], strides = [1, 1]} : vector<12x142xf32> to vector<12x16xf32>
    %35 = vector.extract_strided_slice %31 {offsets = [0, 54], sizes = [12, 16], strides = [1, 1]} : vector<12x142xf32> to vector<12x16xf32>
    %36 = vector.extract_strided_slice %31 {offsets = [0, 72], sizes = [12, 16], strides = [1, 1]} : vector<12x142xf32> to vector<12x16xf32>
    %37 = vector.extract_strided_slice %31 {offsets = [0, 90], sizes = [12, 16], strides = [1, 1]} : vector<12x142xf32> to vector<12x16xf32>
    %38 = vector.extract_strided_slice %31 {offsets = [0, 108], sizes = [12, 16], strides = [1, 1]} : vector<12x142xf32> to vector<12x16xf32>
    %39 = vector.extract_strided_slice %31 {offsets = [0, 126], sizes = [12, 16], strides = [1, 1]} : vector<12x142xf32> to vector<12x16xf32>
    %40 = tpu.concatenate %32, %33, %34, %35, %36, %37, %38, %39 in 1 : vector<12x16xf32>, vector<12x16xf32>, vector<12x16xf32>, vector<12x16xf32>, vector<12x16xf32>, vector<12x16xf32>, vector<12x16xf32>, vector<12x16xf32> -> vector<12x128xf32>
    %c0_20 = arith.constant 0 : index
    %c0_21 = arith.constant 0 : index
    %c0_22 = arith.constant 0 : index
    %41 = vector.load %arg5[%c0_20, %c0_21, %c0_22] : memref<1x12x128xf32, #tpu.memory_space<vmem>>, vector<1x12x128xf32>
    %42 = vector.shape_cast %41 : vector<1x12x128xf32> to vector<12x128xf32>
    %43 = vector.shape_cast %40 : vector<12x128xf32> to vector<1x12x128xf32>
    tpu.vector_store %arg5[%c0_20, %c0_21, %c0_22], %43 {strides = array<i32>} : memref<1x12x128xf32, #tpu.memory_space<vmem>>, vector<1x12x128xf32>,
    return
  }
  func.func @transform_0(%arg0: i32, %arg1: i32) -> (i32, i32, i32, i32) {
    %c0_i32 = arith.constant 0 : i32
    %c0_i32_0 = arith.constant 0 : i32
    %c0_i32_1 = arith.constant 0 : i32
    return %arg0, %arg1, %c0_i32, %c0_i32_0 : i32, i32, i32, i32
  }
  func.func @transform_1(%arg0: i32, %arg1: i32) -> (i32, i32) {
    %c0_i32 = arith.constant 0 : i32
    %c0_i32_0 = arith.constant 0 : i32
    %c0_i32_1 = arith.constant 0 : i32
    return %c0_i32, %c0_i32_0 : i32, i32
  }
  func.func @transform_2(%arg0: i32, %arg1: i32) -> (i32, i32) {
    %c0_i32 = arith.constant 0 : i32
    %c0_i32_0 = arith.constant 0 : i32
    %c0_i32_1 = arith.constant 0 : i32
    return %c0_i32, %c0_i32_0 : i32, i32
  }
  func.func @transform_3(%arg0: i32, %arg1: i32) -> (i32, i32, i32) {
    %c0_i32 = arith.constant 0 : i32
    %c0_i32_0 = arith.constant 0 : i32
    return %arg0, %c0_i32, %arg1 : i32, i32, i32
  }
}

</mosaic_0001>

<bundles_post_ra>
// kernel: tpu_custom_call.1
= control target key start
LH: loop header
LB: loop body
LE: loop exit
PB: predicated region body
PF: predicated region fallthrough
CT: control target
= control target key end

     0   :  { %8 = vsyncpa [#allocation4], 0  ;;  %s1069_s0 = inlined_call_operand.hbm [shape: f32[2,2,8,180], index: 0, kind: input, shape index: {}]   ;;  %s1070_s1 = inlined_call_operand.vmem [shape: f32[12,72], index: 1, kind: input, shape index: {}]   ;;  %s1071_s2 = inlined_call_operand.vmem [shape: f32[12,1], index: 2, kind: input, shape index: {}]   ;;  %s1072_s3 = inlined_call_operand.vmem [shape: f32[2,12,256], index: 3, kind: output, shape index: {}]  }
   0x1   :  { %10 = vsyncpa [#allocation4 + $0x1], 0  ;;  %s877_s12 = smov 0   ;;  %s879_s13 = smov 0  }
   0x2   :  { %s881_s14 = smov 0   ;;  %s883_s15 = smov 0  }
   0x3   :  { %s885_s16 = smov 0   ;;  %s887_s17 = smov 0  }
   0x4   :  { %s889_s18 = smov 0   ;;  %s891_s19 = smov 0  }
   0x5 LB: > { %s619_s20 = sadd.s32 4294967295, %s838_s19   ;;  %s25_s21 = sadd.s32 1, %s830_s17  ;;  %s838_s19 = sphi %s891_s19, %s16_s19   ;;  %s834_s18 = sphi %s889_s18, %s1083_s18   ;;  %s830_s17 = sphi %s887_s17, %s1082_s17   ;;  %s826_s16 = sphi %s885_s16, %s1081_s16   ;;  %s822_s15 = sphi %s883_s15, %s1080_s15   ;;  %s818_s14 = sphi %s881_s14, %s1079_s14   ;;  %s814_s13 = sphi %s879_s13, %s1078_s13   ;;  %s810_s12 = sphi %s877_s12, %s1077_s12  }
   0x6   : > { %p26_p0 = scmp.ge.s32.totalorder %s25_s21, 2  ;;  %s28_s22 = sadd.s32 1, %s834_s18 }
   0x7   : > { %s37_s23 = sadd.s32 1, %s818_s14  ;;  %p44_p1 = scmp.ne.s32.totalorder %s818_s14, %s814_s13 }
   0x8   : > { %s1085_s21 = smov (%p26_p0, %s25_s21), 0  ;;  %s1087_s22 = smov (!%p26_p0, %s28_s22), %s834_s18 }
   0x9   : > { %s33_s24 = ssub.s32 %s830_s17, %s1085_s21  ;;  %p45_p2 = scmp.eq.s32.totalorder %s838_s19, 0 }
   0xa   : > { %p30_p3 = scmp.ge.s32.totalorder %s1087_s22, 2  ;;  %p50_p4 = scmp.ne.s32.totalorder %s814_s13, %s810_s12 }
   0xb   : > { %p931_p5 = por %p45_p2, %p44_p1  ;;  %p51_p6 = scmp.eq.s32.totalorder %s619_s20, 0 }
   0xc   : > { %s1089_s22 = smov (%p30_p3, %s1087_s22), 0  ;;  %p118_p8 = scmp.eq.s32.totalorder %s619_s20, 3 }
   0xd   : > { %p937_p7 = por %p51_p6, %p50_p4  ;;  %s32_s27 = ssub.s32 %s834_s18, %s1089_s22 }
   0xe   : > { %s34_s28 = sor.u32 %s33_s24, %s32_s27  ;;  %p946_p9 = por %p118_p8, %p44_p1 }
   0xf   : > { %p35_p10 = scmp.eq.s32.totalorder %s34_s28, 0  ;;  %p661_p11 = scmp.lt.s32.totalorder %s838_s19, 4 }
  0x10   : > { %s150_s30 = sand.u32 1, %s818_s14   ;;  %s624_s4 = sshll.u32 %s830_s17, 1 }
  0x11   : > { %s954_s5 = scalar_select %p35_p10, %s818_s14, %s37_s23  }
  0x12   : > { %s623_s6 = sshll.u32 %s150_s30, 4  ;;  %s625_s7 = sshll.u32 %s834_s18, 2 }
  0x13   : > { %s160_s8 = sadd.s32 %s625_s7, %s624_s4  ;;  %s154_s9 = scalar_lea.vmem [#allocation3], %s623_s6 }
  0x14   : > { %s164_s10 = sshll.u32 %s154_s9, 4  ;;  %s626_s11 = sshll.u32 %s160_s8, 7  ;;  %s165_s10 = int_to_ptr.vmem [resolvable:$true] %s164_s10 }
  0x15   : > { %s162_s24 = scalar_lea.hbm %s1069_s0, %s626_s11  ;;  %p962_p12 = pnand %p661_p11, %p931_p5 }
  0x16   : > { %p627_p13 = scmp.ge.s32.totalorder %s838_s19, 1  ;;  %p169_p0 = scmp.lt.s32.totalorder %s838_s19, 5 }
  0x17   : > { %s151_s23 = scalar_lea.sflag [#allocation4], %s150_s30  ;;  %p746_p1 = pneg %p962_p12 }
  0x18   : > { %s757_s28 = scalar_lea.vmem %s165_s10, 256  ;;  %s840_s4 = smov [#allocation3]  }
  0x19   : > { %p758_p2 = scmp.ne.s32.totalorder %s165_s10, %s757_s28  ;;  %s762_s6 = sshll.u32 %s840_s4, 4  ;;  %s763_s6 = int_to_ptr.vmem [resolvable:$false] %s762_s6 }
  0x1a   : > { %s764_s7 = scalar_lea.vmem %s763_s6, 512  ;;  %p765_p6 = scmp.lt.s32.totalorder %s165_s10, %s763_s6 }
  0x1b   : > { %p760_p3 = pnand %p758_p2, %p746_p1  ;;  %p766_p8 = scmp.lt.s32.totalorder %s764_s7, %s757_s28 }
  0x1d   : > { %p761_p4 = pneg %p760_p3  ;;  %p767_p5 = por %p766_p8, %p765_p6 }
  0x1f   : > { %p768_p10 = pnand %p767_p5, %p761_p4 }
  0x21   : > { %771 = shalt.err (!%p768_p10)
}
  0x22   : > { %660 = dma.hbm_to_vmem [thread:$0]  (!%p962_p12), %s162_s24, 256, %s165_s10, %s151_s23  }
  0x23   : > { %p170_p11 = pnand %p627_p13, %p169_p0 }
  0x24   : > { %s175_s25 = sand.u32 (!%p170_p11), 1, %s814_s13  }
  0x25   : > { %173 = sbr.rel (%p170_p11) target bundleno = 551 (0x227), region = 32  ;;  %s977_s30 = sshll.u32 (!%p170_p11), %s175_s25, 4 }
  0x26   : > { %s176_s8 = scalar_lea.sflag (!%p170_p11), [#allocation4], %s175_s25  ;;  %s179_s9 = scalar_lea.vmem (!%p170_p11), [#allocation3], %s977_s30 }
  0x2a   : > { %805 = dma.done.wait (%p937_p7), %s176_s8, 256  }
  0x2b   : > { %807 = vsyncadd (%p937_p7), %s176_s8, 4294967040  ;;  %v984_v0 = vld [vmem:[%s179_s9] sm:$0xff]  ;;  %v202_v1 = vld [vmem:[%s179_s9 + $0x8] sm:$0xff]  ;;  %vm204_vm0 = vcmask 113664   ;;  %s841_s10 = smov 91   ;;  %s842_s11 = smov 90   ;;  %v404_v41 = vlaneseq }
  0x2c   : > { %268 = vrot.lane.b32.xlu1 %v984_v0, %s841_s10  ;;  %278 = vrot.lane.b32.xlu0 %v984_v0, %s842_s11  ;;  %205 = vst.msk [vmem:[#allocation2 + $0x8] sm:$0xff] %vm204_vm0, %v202_v1  ;;  %s843_s12 = smov 92   ;;  %s844_s26 = smov 108   ;;  %v848_v2 = vmov 0.0   ;;  %v850_v3 = vmov 0   ;;  %v308_v5 = vld [vmem:[%s1071_s2] sm:$0xff] }
  0x2d   : > { %s845_s20 = smov 109   ;;  %s846_s24 = smov 110   ;;  %391 = vmatprep.mubr.f32.mxu0 %v848_v2  ;;  %397 = vmatprep.mubr.f32.mxu1 %v848_v2  ;;  %v309_v4 = vld [vmem:[%s1071_s2 + $0x8] sm:$0xf]  ;;  %vm272_vm1 = vcmask 744448   ;;  %vm282_vm2 = vcmask 736256  }
  0x2e   : > { %s847_s27 = smov 126   ;;  %s849_s23 = smov 127   ;;  %743 = vset.pattern.permute.xlu1 %v850_v3  ;;  %742 = vset.pattern.permute.xlu0 %v850_v3  ;;  %vm262_vm3 = vcmask 752640   ;;  %vm252_vm4 = vcmask 883712   ;;  %vm242_vm5 = vcmask 891904   ;;  %vm232_vm6 = vcmask 900096  }
  0x2f   : > { %vm222_vm7 = vcmask 1031168   ;;  %vm212_vm8 = vcmask 1039360   ;;  %v288_v39 = vld [vmem:[%s1070_s1] sm:$0xff]  ;;  %vm320_vm9 = vcmask 588800   ;;  %v289_v40 = vld [vmem:[%s1070_s1 + $0x8] sm:$0xf] }
  0x30   : > { %270 = vrot.lane.b32.xlu1 %v202_v1, %s841_s10  ;;  %280 = vrot.lane.b32.xlu0 %v202_v1, %s842_s11  ;;  %v405_v44 = vshrl.u32 %v404_v41, 7  ;;  %s851_s11 = smov 124   ;;  %vm470_vm11 = vcmask 130048   ;;  %vm473_vm12 = vcmask 261120   ;;  %vm476_vm13 = vcmask 392192   ;;  %s633_s28 = sshll.u32 (%p946_p9), %s826_s16, 2 }
  0x31   : > { %vm479_vm14 = vcmask 523264   ;;  %vm482_vm15 = vcmask 654336   ;;  %s501_s4 = sadd.s32 (%p946_p9), %s822_s15, %s633_s28 }
  0x32   : > { %vm407_vm10 = vcmp.ge.s32.totalorder %v405_v44, 4 }
  0x33   : > { %v291_v38 = vld [vmem:[#allocation2 + $0x8] sm:$0xff] }
  0x34   : > { %260 = vrot.lane.b32.xlu1 %v202_v1, %s843_s12  ;;  %258 = vrot.lane.b32.xlu0 %v984_v0, %s843_s12  ;;  %s852_s12 = smov 122  }
  0x38   : > { %250 = vrot.lane.b32.xlu1 %v202_v1, %s844_s26  ;;  %248 = vrot.lane.b32.xlu0 %v984_v0, %s844_s26  ;;  %s853_s26 = smov 120  }
  0x3c   : > { %240 = vrot.lane.b32.xlu1 %v202_v1, %s845_s20  ;;  %238 = vrot.lane.b32.xlu0 %v984_v0, %s845_s20  ;;  %s854_s20 = smov 118  }
  0x40   : > { %230 = vrot.lane.b32.xlu1 %v202_v1, %s846_s24  ;;  %228 = vrot.lane.b32.xlu0 %v984_v0, %s846_s24  ;;  %s855_s24 = smov 116  }
  0x44   : > { %220 = vrot.lane.b32.xlu1 %v202_v1, %s847_s27  ;;  %218 = vrot.lane.b32.xlu0 %v984_v0, %s847_s27 }
  0x48   : > { %210 = vrot.lane.b32.xlu1 %v202_v1, %s849_s23  ;;  %208 = vrot.lane.b32.xlu0 %v984_v0, %s849_s23  ;;  %s200_s23 = scalar_lea.vmem [#allocation5], %s977_s30  ;;  %s634_s30 = sshll.u32 (%p946_p9), %s501_s4, 3 }
  0x49   : > { %s503_s25 = scalar_lea.vmem (%p946_p9), %s1072_s3, %s634_s30 }
  0x4c   : > { %317 = vperm.xlu1 %743, %v309_v4   ;;  %312 = vperm.xlu0 %742, %v308_v5  }
  0x9e   : > { %v269_v6 = vpop.permute.xlu1 %268  ;;  %v279_v7 = vpop.permute.xlu0 %278 }
  0xa2   : > { %v271_v8 = vpop.permute.xlu1 %270  ;;  %v281_v9 = vpop.permute.xlu0 %280 }
  0xa3   : > { %v273_v10 = vsel %vm272_vm1, %v269_v6, %v271_v8  ;;  %277 = vst.msk [vmem:[#allocation2 + $0x78] sm:$0xff] %vm204_vm0, %v271_v8  ;;  %v283_v11 = vsel %vm282_vm2, %v279_v7, %v281_v9  ;;  %287 = vst.msk [vmem:[#allocation2 + $0x88] sm:$0xff] %vm204_vm0, %v281_v9  ;;  %vm465_vm1 = vcmask 932864   ;;  %vm488_vm2 = vcmask 916480  }
  0xa6   : > { %v261_v12 = vpop.permute.xlu1 %260  ;;  %v259_v13 = vpop.permute.xlu0 %258 }
  0xa7   : > { %267 = vst.msk [vmem:[#allocation2 + $0x68] sm:$0xff] %vm204_vm0, %v261_v12  ;;  %v263_v14 = vsel %vm262_vm3, %v259_v13, %v261_v12 }
  0xaa   : > { %v251_v15 = vpop.permute.xlu1 %250  ;;  %v249_v16 = vpop.permute.xlu0 %248  ;;  %v307_v17 = vld [vmem:[#allocation2 + $0x88] sm:$0xff]  ;;  %v305_v19 = vld [vmem:[#allocation2 + $0x78] sm:$0xff] }
  0xab   : > { %257 = vst.msk [vmem:[#allocation2 + $0x58] sm:$0xff] %vm204_vm0, %v251_v15  ;;  %v253_v18 = vsel %vm252_vm4, %v249_v16, %v251_v15  ;;  %341 = vmatprep.subr.mxu0 %v307_v17  ;;  %637 = vmatprep.subr.mxu1 %v307_v17 }
  0xac   : > { %342 = vmatpush1.msra.mxu0 %v283_v11  ;;  %646 = vmatpush1.msra.mxu1 %v283_v11 }
  0xad   : > { %343 = vmatprep.subr.mxu0 %v305_v19  ;;  %638 = vmatprep.subr.mxu1 %v305_v19 }
  0xae   : > { %v241_v20 = vpop.permute.xlu1 %240  ;;  %344 = vmatpush1.msra.mxu0 %v273_v10  ;;  %647 = vmatpush1.msra.mxu1 %v273_v10  ;;  %v239_v21 = vpop.permute.xlu0 %238  ;;  %v303_v22 = vld [vmem:[#allocation2 + $0x68] sm:$0xff] }
  0xaf   : > { %247 = vst.msk [vmem:[#allocation2 + $0x48] sm:$0xff] %vm204_vm0, %v241_v20  ;;  %v243_v23 = vsel %vm242_vm5, %v239_v21, %v241_v20  ;;  %345 = vmatprep.subr.mxu0 %v303_v22  ;;  %639 = vmatprep.subr.mxu1 %v303_v22 }
  0xb0   : > { %346 = vmatpush1.msra.mxu0 %v263_v14  ;;  %648 = vmatpush1.msra.mxu1 %v263_v14 }
  0xb2   : > { %v231_v24 = vpop.permute.xlu1 %230  ;;  %v229_v25 = vpop.permute.xlu0 %228  ;;  %v301_v26 = vld [vmem:[#allocation2 + $0x58] sm:$0xff] }
  0xb3   : > { %237 = vst.msk [vmem:[#allocation2 + $0x38] sm:$0xff] %vm204_vm0, %v231_v24  ;;  %v233_v27 = vsel %vm232_vm6, %v229_v25, %v231_v24  ;;  %347 = vmatprep.subr.mxu0 %v301_v26  ;;  %640 = vmatprep.subr.mxu1 %v301_v26 }
  0xb4   : > { %348 = vmatpush1.msra.mxu0 %v253_v18  ;;  %649 = vmatpush1.msra.mxu1 %v253_v18 }
  0xb6   : > { %v221_v28 = vpop.permute.xlu1 %220  ;;  %v219_v29 = vpop.permute.xlu0 %218  ;;  %v299_v30 = vld [vmem:[#allocation2 + $0x48] sm:$0xff] }
  0xb7   : > { %227 = vst.msk [vmem:[#allocation2 + $0x28] sm:$0xff] %vm204_vm0, %v221_v28  ;;  %v223_v31 = vsel %vm222_vm7, %v219_v29, %v221_v28  ;;  %349 = vmatprep.subr.mxu0 %v299_v30  ;;  %641 = vmatprep.subr.mxu1 %v299_v30 }
  0xb8   : > { %350 = vmatpush1.msra.mxu0 %v243_v23  ;;  %650 = vmatpush1.msra.mxu1 %v243_v23 }
  0xba   : > { %v211_v32 = vpop.permute.xlu1 %210  ;;  %v209_v33 = vpop.permute.xlu0 %208  ;;  %v297_v34 = vld [vmem:[#allocation2 + $0x38] sm:$0xff] }
  0xbb   : > { %217 = vst.msk [vmem:[#allocation2 + $0x18] sm:$0xff] %vm204_vm0, %v211_v32  ;;  %v213_v35 = vsel %vm212_vm8, %v209_v33, %v211_v32  ;;  %351 = vmatprep.subr.mxu0 %v297_v34  ;;  %642 = vmatprep.subr.mxu1 %v297_v34  ;;  %vm485_vm0 = vcmask 785408  }
  0xbc   : > { %352 = vmatpush1.msra.mxu0 %v233_v27  ;;  %651 = vmatpush1.msra.mxu1 %v233_v27 }
  0xbe   : > { %v295_v36 = vld [vmem:[#allocation2 + $0x28] sm:$0xff] }
  0xbf   : > { %353 = vmatprep.subr.mxu0 %v295_v36  ;;  %643 = vmatprep.subr.mxu1 %v295_v36 }
  0xc0   : > { %354 = vmatpush1.msra.mxu0 %v223_v31  ;;  %652 = vmatpush1.msra.mxu1 %v223_v31 }
  0xc2   : > { %v293_v37 = vld [vmem:[#allocation2 + $0x18] sm:$0xff] }
  0xc3   : > { %355 = vmatprep.subr.mxu0 %v293_v37  ;;  %644 = vmatprep.subr.mxu1 %v293_v37 }
  0xc4   : > { %356 = vmatpush1.msra.mxu0 %v213_v35  ;;  %653 = vmatpush1.msra.mxu1 %v213_v35 }
  0xc5   : > { %357 = vmatprep.subr.mxu0 %v291_v38  ;;  %645 = vmatprep.subr.mxu1 %v291_v38 }
  0xc6   : > { %358 = vmatpush1.msra.mxu0 %v984_v0  ;;  %654 = vmatpush1.msra.mxu1 %v984_v0 }
  0xc7   : > { %630 = vmatmul.mubr.msk.f32.vlgmr.msra.gmra.mxu0 %vm320_vm9, %v288_v39  ;;  %631 = vmatmul.mubr.msk.f32.vlgmr.msra.gmra.mxu1 %vm320_vm9, %v289_v40  ;;  %v318_v42 = vpop.permute.xlu1 %317  ;;  %v313_v43 = vpop.permute.xlu0 %312 }
 0x187   : > { %v393_v45 = vpop.f32.mrf.mxu0  ;;  %v399_v46 = vpop.f32.mrf.mxu1 }
 0x188   : > { %v394_v47 = vadd.f32 %v393_v45, %v313_v43  ;;  %v400_v48 = vadd.f32 %v399_v46, %v318_v42 }
 0x189   : > { %v395_v52 = vpop.f32.mrf.mxu0  ;;  %v401_v55 = vpop.f32.mrf.mxu1 }
 0x18a   : > { %v409_v49 = vmax.f32 %v394_v47, 0.0  ;;  %v411_v50 = vmax.f32 %v400_v48, 0.0  ;;  %v396_v53 = vadd.f32 %v395_v52, %v313_v43  ;;  %v402_v56 = vadd.f32 %v401_v55, %v318_v42 }
 0x18c   : > { %v413_v51 = vsel %vm407_vm10, %v409_v49, %v394_v47  ;;  %421 = vrot.lane.b32.xlu0 %v411_v50, %s847_s27  ;;  %v410_v54 = vmax.f32 %v396_v53, 0.0  ;;  %v412_v58 = vmax.f32 %v402_v56, 0.0 }
 0x18d   : > { %419 = vrot.lane.b32.xlu1 %v413_v51, %s847_s27  ;;  %s856_s27 = smov 114  }
 0x18e   : > { %v414_v57 = vsel %vm407_vm10, %v410_v54, %v396_v53 }
 0x190   : > { %427 = vrot.lane.b32.xlu0 %v411_v50, %s851_s11 }
 0x191   : > { %425 = vrot.lane.b32.xlu1 %v413_v51, %s851_s11 }
 0x194   : > { %433 = vrot.lane.b32.xlu0 %v411_v50, %s852_s12 }
 0x195   : > { %431 = vrot.lane.b32.xlu1 %v413_v51, %s852_s12 }
 0x198   : > { %439 = vrot.lane.b32.xlu0 %v411_v50, %s853_s26 }
 0x199   : > { %437 = vrot.lane.b32.xlu1 %v413_v51, %s853_s26 }
 0x19c   : > { %445 = vrot.lane.b32.xlu0 %v411_v50, %s854_s20 }
 0x19d   : > { %443 = vrot.lane.b32.xlu1 %v413_v51, %s854_s20 }
 0x1a0   : > { %451 = vrot.lane.b32.xlu0 %v411_v50, %s855_s24 }
 0x1a1   : > { %449 = vrot.lane.b32.xlu1 %v413_v51, %s855_s24 }
 0x1a4   : > { %459 = vrot.lane.b32.xlu0 %v414_v57, %s856_s27 }
 0x1a5   : > { %457 = vrot.lane.b32.xlu1 %v413_v51, %s856_s27 }
 0x1a8   : > { %463 = vrot.lane.b32.xlu0 %v412_v58, %s856_s27 }
 0x1a9   : > { %461 = vrot.lane.b32.xlu1 %v411_v50, %s856_s27 }
 0x1fe   : > { %v422_v59 = vpop.permute.xlu0 %421 }
 0x1ff   : > { %v420_v60 = vpop.permute.xlu1 %419  ;;  %v472_v12 = vsel %vm470_vm11, %v411_v50, %v422_v59 }
 0x200   : > { %v471_v6 = vsel %vm470_vm11, %v413_v51, %v420_v60 }
 0x202   : > { %v428_v61 = vpop.permute.xlu0 %427 }
 0x203   : > { %v426_v62 = vpop.permute.xlu1 %425  ;;  %v475_v15 = vsel %vm473_vm12, %v472_v12, %v428_v61 }
 0x204   : > { %v474_v8 = vsel %vm473_vm12, %v471_v6, %v426_v62 }
 0x206   : > { %v434_v63 = vpop.permute.xlu0 %433 }
 0x207   : > { %v432_v0 = vpop.permute.xlu1 %431  ;;  %v478_v18 = vsel %vm476_vm13, %v475_v15, %v434_v63 }
 0x208   : > { %v477_v9 = vsel %vm476_vm13, %v474_v8, %v432_v0 }
 0x20a   : > { %v440_v1 = vpop.permute.xlu0 %439 }
 0x20b   : > { %v438_v2 = vpop.permute.xlu1 %437  ;;  %v481_v20 = vsel %vm479_vm14, %v478_v18, %v440_v1 }
 0x20c   : > { %v480_v10 = vsel %vm479_vm14, %v477_v9, %v438_v2 }
 0x20e   : > { %v446_v3 = vpop.permute.xlu0 %445 }
 0x20f   : > { %v444_v4 = vpop.permute.xlu1 %443  ;;  %v484_v22 = vsel %vm482_vm15, %v481_v20, %v446_v3 }
 0x210   : > { %v483_v13 = vsel %vm482_vm15, %v480_v10, %v444_v4 }
 0x212   : > { %v452_v5 = vpop.permute.xlu0 %451 }
 0x213   : > { %v450_v7 = vpop.permute.xlu1 %449  ;;  %v487_v24 = vsel %vm485_vm0, %v484_v22, %v452_v5 }
 0x214   : > { %v486_v16 = vsel %vm485_vm0, %v483_v13, %v450_v7 }
 0x216   : > { %v460_v11 = vpop.permute.xlu0 %459 }
 0x217   : > { %v458_v14 = vpop.permute.xlu1 %457 }
 0x218   : > { %v466_v17 = vsel %vm465_vm1, %v458_v14, %v460_v11 }
 0x219   : > { %v489_v19 = vsel %vm488_vm2, %v486_v16, %v466_v17 }
 0x21a   : > { %491 = vst [vmem:[%s200_s23] sm:$0xff] %v489_v19  ;;  %v464_v21 = vpop.permute.xlu0 %463  ;;  %499 = sbr.rel (!%p946_p9) target bundleno = 551 (0x227), region = 40 }
 0x21b   : > { %v462_v23 = vpop.permute.xlu1 %461 }
 0x21c   : > { %v467_v25 = vsel %vm465_vm1, %v462_v23, %v464_v21 }
 0x21d   : > { %v490_v26 = vsel %vm488_vm2, %v487_v24, %v467_v25 }
 0x21e   : > { %492 = vst [vmem:[%s200_s23 + $0x8] sm:$0xf] %v490_v26 }
 0x221   : > { %v534_v27 = vld [vmem:[%s200_s23] sm:$0xff] }
 0x222   : > { %535 = vst [vmem:[%s503_s25] sm:$0xff] %v534_v27 }
 0x225   : > { %v536_v28 = vld [vmem:[%s200_s23 + $0x8] sm:$0xff] }
 0x226   : > { %537 = vst [vmem:[%s503_s25 + $0x10] sm:$0xff] %v536_v28 }
 0x227 PF: > { %s16_s19 = sadd.s32 1, %s838_s19   ;;  %s1077_s12 = smov %s814_s13 }
 0x228   : > { %p13_p7 = scmp.ge.s32.totalorder %s16_s19, 6   ;;  %s1078_s13 = smov %s818_s14 }
 0x229   : > { %s1079_s14 = smov %s954_s5  ;;  %s1080_s15 = smov %s830_s17 }
 0x22a   : > { %s1081_s16 = smov %s834_s18  ;;  %s1082_s17 = smov %s1085_s21 }
 0x22b   : > { %s1083_s18 = smov %s1089_s22  ;;  %15 = sbr.rel (!%p13_p7) target bundleno = 5 (0x5), region = 110 }
 0x230   :  { %553 = vsyncpa [#allocation4], 1 }
 0x231   :  { %555 = vsyncpa [#allocation4 + $0x1], 1 }

</bundles_post_ra>
